<compile_context>
chip_gen: v6e
topology: v6e:2x2x1
jax: 0.10.0
libtpu: 0.0.40
codegen_flags: <defaults>
</compile_context>

<pallas_src>
import functools
import math

import jax
import jax.numpy as jnp
from jax import lax
from jax.experimental import pallas as pl
from jax.experimental.pallas import tpu as pltpu

_LANE = 128


def _round_up(x, m):
    return (x + m - 1) // m * m


# --------------------- per-generation VMEM / tile budgets -------------------

def _tpu_vmem_capacity():
    try:
        info = pltpu.get_tpu_info()
        cap = getattr(info, "vmem_capacity_bytes", None)
        if cap:
            return int(cap)
    except Exception:
        pass
    return 64 * 1024 * 1024                      # conservative default (v7x)


_VMEM_CAP = _tpu_vmem_capacity()
_VMEM_LIMIT = min(int(_VMEM_CAP * 3 // 4), 100 * 1024 * 1024)
if _VMEM_CAP >= 100 * 1024 * 1024:               # v5e / v6e (128 MiB VMEM)
    _TM_CAP, _TN_CAP, _TK_CAP, _DW_TC_CAP = 1024, 1024, 768, 1024
else:                                            # v7x (64 MiB VMEM)
    _TM_CAP, _TN_CAP, _TK_CAP, _DW_TC_CAP = 512, 768, 768, 512


def _cp(c):
    """Channel count padded so that some tile in {256,384,512,640,768} divides
    it (keeps MXU tiles from collapsing to 128, e.g. 1344 -> 1536)."""
    p = _round_up(c, _LANE)
    if p <= 256:
        return p
    while not any(p % t == 0 for t in range(768, 255, -_LANE)):
        p += _LANE
    return p


def _pick_tile(dim, cap):
    """Largest multiple of 128 that divides `dim` (a multiple of 128), <= cap."""
    t = max(_LANE, (min(cap, dim) // _LANE) * _LANE)
    while dim % t:
        t -= _LANE
    return t


def _pad_axis(x, axis, size):
    pad = size - x.shape[axis]
    if pad <= 0:
        return x
    cfg = [(0, 0)] * x.ndim
    cfg[axis] = (0, pad)
    return jnp.pad(x, cfg)


# --------------- 2D tiled matmul (1x1 conv, batch folded into M) ------------

def _mm2d_kernel(a_ref, b_ref, scale_ref, bias_ref, o_ref, acc_ref, *, act):
    k = pl.program_id(2)

    @pl.when(k == 0)
    def _():
        acc_ref[...] = jnp.zeros_like(acc_ref)

    acc_ref[...] += jnp.dot(a_ref[...], b_ref[...],
                            preferred_element_type=jnp.float32)

    @pl.when(k == pl.num_programs(2) - 1)
    def _():
        y = acc_ref[...] * scale_ref[...] + bias_ref[...]    # folded BN, fp32
        if act == "silu":
            y = y * jax.nn.sigmoid(y)
        o_ref[...] = y.astype(o_ref.dtype)


@functools.partial(jax.jit, static_argnames=("act", "out_dtype"))
def matmul_bn_act(a, b, scale, bias, *, act="none", out_dtype=jnp.bfloat16):
    """(M, K) @ (K, C) + folded BN + optional SiLU.  Batch is pre-folded into M
    by the callers (stem / expand / head / FC)."""
    m, _ = a.shape
    kb, c = b.shape
    a = _pad_axis(a, 1, kb).astype(jnp.bfloat16)
    b = b.astype(jnp.bfloat16)
    scale = _pad_axis(scale.reshape(1, -1), 1, c).astype(jnp.float32)
    bias = _pad_axis(bias.reshape(1, -1), 1, c).astype(jnp.float32)

    tm = min(_TM_CAP, _round_up(m, 8))
    mp = _round_up(m, tm)
    if mp != m:
        a = _pad_axis(a, 0, mp)
    tk = _pick_tile(kb, _TK_CAP)
    tn = _pick_tile(c, _TN_CAP)
    grid = (mp // tm, c // tn, kb // tk)

    out = pl.pallas_call(
        functools.partial(_mm2d_kernel, act=act),
        out_shape=jax.ShapeDtypeStruct((mp, c), out_dtype),
        grid=grid,
        in_specs=[pl.BlockSpec((tm, tk), lambda i, j, k: (i, k)),
                  pl.BlockSpec((tk, tn), lambda i, j, k: (k, j)),
                  pl.BlockSpec((1, tn), lambda i, j, k: (0, j)),
                  pl.BlockSpec((1, tn), lambda i, j, k: (0, j))],
        out_specs=pl.BlockSpec((tm, tn), lambda i, j, k: (i, j)),
        scratch_shapes=[pltpu.VMEM((tm, tn), jnp.float32)],
        compiler_params=pltpu.CompilerParams(
            dimension_semantics=("parallel", "parallel", "arbitrary"),
            vmem_limit_bytes=_VMEM_LIMIT),
    )(a, b, scale, bias)
    return out[:m] if mp != m else out


# ------------ batched projection matmul with fused SE gate + residual -------

def _proj_kernel(*refs, has_res):
    if has_res:
        a_ref, b_ref, scale_ref, bias_ref, gate_ref, res_ref, o_ref, acc_ref = refs
    else:
        a_ref, b_ref, scale_ref, bias_ref, gate_ref, o_ref, acc_ref = refs
        res_ref = None
    k = pl.program_id(3)

    @pl.when(k == 0)
    def _():
        acc_ref[...] = jnp.zeros_like(acc_ref)

    # SE gate (per batch, per input channel) fused on the LHS tile as a single
    # bf16 VPU multiply; no fp32 up/down-casts under the MXU.
    a = a_ref[0] * gate_ref[0].astype(jnp.bfloat16)
    acc_ref[...] += jnp.dot(a, b_ref[...], preferred_element_type=jnp.float32)

    @pl.when(k == pl.num_programs(3) - 1)
    def _():
        y = acc_ref[...] * scale_ref[...] + bias_ref[...]    # folded BN, fp32
        if has_res:
            y = y + res_ref[0].astype(jnp.float32)           # fused residual
        o_ref[...] = y.astype(o_ref.dtype)[None]


@functools.partial(jax.jit, static_argnames=("out_dtype",))
def proj_matmul_gated(a, b, scale, bias, gate, res=None, *,
                      out_dtype=jnp.bfloat16):
    """(N, M, K) @ (K, C) + folded BN, with a per-(batch, K-channel) SE gate on
    the LHS and an optional fused residual add."""
    n, m, _ = a.shape
    kb, c = b.shape
    a = _pad_axis(a, 2, kb).astype(jnp.bfloat16)
    b = b.astype(jnp.bfloat16)
    scale = _pad_axis(scale.reshape(1, -1), 1, c).astype(jnp.float32)
    bias = _pad_axis(bias.reshape(1, -1), 1, c).astype(jnp.float32)
    gate = _pad_axis(gate, 1, kb).astype(jnp.float32).reshape(n, 1, kb)

    tm = min(_TM_CAP, _round_up(m, 8))
    mp = _round_up(m, tm)
    if mp != m:
        a = _pad_axis(a, 1, mp)
        if res is not None:
            res = _pad_axis(res, 1, mp)
    tk = _pick_tile(kb, _TK_CAP)
    tn = _pick_tile(c, _TN_CAP)
    grid = (n, mp // tm, c // tn, kb // tk)

    in_specs = [
        pl.BlockSpec((1, tm, tk), lambda bb, i, j, k: (bb, i, k)),
        pl.BlockSpec((tk, tn), lambda bb, i, j, k: (k, j)),
        pl.BlockSpec((1, tn), lambda bb, i, j, k: (0, j)),
        pl.BlockSpec((1, tn), lambda bb, i, j, k: (0, j)),
        pl.BlockSpec((1, 1, tk), lambda bb, i, j, k: (bb, 0, k)),
    ]
    args = [a, b, scale, bias, gate]
    if res is not None:
        res = _pad_axis(res, 2, c).astype(jnp.bfloat16)
        in_specs.append(pl.BlockSpec((1, tm, tn), lambda bb, i, j, k: (bb, i, j)))
        args.append(res)

    out = pl.pallas_call(
        functools.partial(_proj_kernel, has_res=res is not None),
        out_shape=jax.ShapeDtypeStruct((n, mp, c), out_dtype),
        grid=grid,
        in_specs=in_specs,
        out_specs=pl.BlockSpec((1, tm, tn), lambda bb, i, j, k: (bb, i, j)),
        scratch_shapes=[pltpu.VMEM((tm, tn), jnp.float32)],
        compiler_params=pltpu.CompilerParams(
            dimension_semantics=("parallel", "parallel", "parallel", "arbitrary"),
            vmem_limit_bytes=_VMEM_LIMIT),
    )(*args)
    return out[:, :m] if mp != m else out


# -------- depthwise 3x3 + BN + SiLU (+ fused SE avg-pool), in-kernel halo ----

def _dw_kernel(x_ref, w_ref, scale_ref, bias_ref, o_ref, pool_ref, xpad_ref, *,
               stride, inv_hw):
    _, h, w, tc = x_ref.shape
    _, ho, wo, _ = o_ref.shape
    # Build the zero-padded halo tile in VMEM -- no HBM round trip for the pad.
    xpad_ref[...] = jnp.zeros_like(xpad_ref)
    xpad_ref[1:h + 1, 1:w + 1, :] = x_ref[0]

    sc = scale_ref[...]                                   # (1, 1, tc) fp32
    bi = bias_ref[...]
    pool_acc = jnp.zeros((1, 1, tc), jnp.float32)
    # TODO(synk): add spatial (H) tiling with a 1-row halo for real B7
    # resolutions (300x300 maps) so the block fits v7x's 64 MiB VMEM.
    for y in range(ho):                                   # static row loop
        acc = jnp.zeros((1, wo, tc), jnp.float32)         # row accumulator
        for ky in range(3):
            r = stride * y + ky
            for kx in range(3):
                if stride == 1:
                    tap = xpad_ref[r:r + 1, kx:kx + wo, :]
                else:
                    # stride-2 folded in via a sublane-strided VMEM load: only
                    # strided output columns are ever read or computed.
                    tap = xpad_ref[r:r + 1, pl.ds(kx, wo, stride), :]
                acc = acc + tap.astype(jnp.float32) * w_ref[ky:ky + 1, kx:kx + 1, :]
        yrow = acc * sc + bi                              # folded BN, fp32
        yrow = yrow * jax.nn.sigmoid(yrow)                # SiLU on the VPU
        o_ref[:, y:y + 1, :, :] = yrow.astype(o_ref.dtype)[None]
        pool_acc = pool_acc + jnp.sum(yrow, axis=1, keepdims=True)
    pool_ref[...] = pool_acc * inv_hw                     # fused SE avg-pool


@functools.partial(jax.jit, static_argnames=("stride",))
def depthwise3x3_bn_silu_pool(x, w3, scale, bias, *, stride):
    """Channel-tiled depthwise 3x3 (padding & stride handled in-kernel) + BN +
    SiLU; also emits the SE global-average-pool of the result."""
    n, h, w, c = x.shape
    ho = (h - 1) // stride + 1
    wo = (w - 1) // stride + 1
    tc = _pick_tile(c, _DW_TC_CAP)
    scale3 = scale.reshape(1, 1, c).astype(jnp.float32)
    bias3 = bias.reshape(1, 1, c).astype(jnp.float32)

    out, pooled = pl.pallas_call(
        functools.partial(_dw_kernel, stride=stride, inv_hw=1.0 / (ho * wo)),
        out_shape=(jax.ShapeDtypeStruct((n, ho, wo, c), jnp.bfloat16),
                   jax.ShapeDtypeStruct((n, 1, c), jnp.float32)),
        grid=(n, c // tc),
        in_specs=[pl.BlockSpec((1, h, w, tc), lambda b, cc: (b, 0, 0, cc)),
                  pl.BlockSpec((3, 3, tc), lambda b, cc: (0, 0, cc)),
                  pl.BlockSpec((1, 1, tc), lambda b, cc: (0, 0, cc)),
                  pl.BlockSpec((1, 1, tc), lambda b, cc: (0, 0, cc))],
        out_specs=(pl.BlockSpec((1, ho, wo, tc), lambda b, cc: (b, 0, 0, cc)),
                   pl.BlockSpec((1, 1, tc), lambda b, cc: (b, 0, cc))),
        scratch_shapes=[pltpu.VMEM((h + 2, w + 2, tc), x.dtype)],
        compiler_params=pltpu.CompilerParams(
            dimension_semantics=("parallel", "parallel"),
            vmem_limit_bytes=_VMEM_LIMIT),
    )(x, w3, scale3, bias3)
    return out, pooled.reshape(n, c)


# ------------------------------ SE gate MLP ---------------------------------

def _se_gate_kernel(p_ref, w1_ref, b1_ref, w2_ref, b2_ref, g_ref):
    p = p_ref[...]                                        # (N, C) fp32 pooled
    s = jnp.dot(p.astype(jnp.bfloat16), w1_ref[...],
                preferred_element_type=jnp.float32) + b1_ref[...]
    s = s * jax.nn.sigmoid(s)                             # SiLU
    g = jnp.dot(s.astype(jnp.bfloat16), w2_ref[...],
                preferred_element_type=jnp.float32) + b2_ref[...]
    g_ref[...] = jax.nn.sigmoid(g)


@jax.jit
def se_gate(pooled, w1, b1, w2, b2):
    """Squeeze-excite gate from the pre-pooled (N, C); per-pixel gating is
    fused into the following projection matmul.
    NOTE: padded channels get gate = sigmoid(0) = 0.5, which is harmless only
    because the corresponding activation columns and projection-weight rows
    are zero-padded (invariant maintained by make_params)."""
    n, c = pooled.shape
    vmem = pl.BlockSpec(memory_space=pltpu.MemorySpace.VMEM)
    # TODO(synk): could be fused into the projection prologue to avoid 55 tiny
    # kernel launches; kept separate for simplicity.
    return pl.pallas_call(
        _se_gate_kernel,
        out_shape=jax.ShapeDtypeStruct((n, c), jnp.float32),
        in_specs=[vmem] * 5,
        out_specs=vmem,
        compiler_params=pltpu.CompilerParams(vmem_limit_bytes=_VMEM_LIMIT),
    )(pooled, w1, b1, w2, b2)


# --------------------------- global average pool ----------------------------

def _pool_kernel(x_ref, o_ref, *, inv_hw):
    x = x_ref[0].astype(jnp.float32)
    o_ref[...] = jnp.sum(x, axis=(0, 1), keepdims=True) * inv_hw


@jax.jit
def global_avg_pool(x):
    n, h, w, c = x.shape
    tc = _pick_tile(c, _DW_TC_CAP)
    out = pl.pallas_call(
        functools.partial(_pool_kernel, inv_hw=1.0 / (h * w)),
        out_shape=jax.ShapeDtypeStruct((n, 1, c), jnp.float32),
        grid=(n, c // tc),
        in_specs=[pl.BlockSpec((1, h, w, tc), lambda b, cc: (b, 0, 0, cc))],
        out_specs=pl.BlockSpec((1, 1, tc), lambda b, cc: (b, 0, cc)),
        compiler_params=pltpu.CompilerParams(
            dimension_semantics=("parallel", "parallel"),
            vmem_limit_bytes=_VMEM_LIMIT),
    )(x)
    return out.reshape(n, c)


# ---------------------------- parameter creation ----------------------------

BLOCK_SETTINGS = [(64, 32, 1, 1, 1), (32, 48, 6, 2, 2), (48, 80, 6, 2, 3),
                  (80, 160, 6, 2, 5), (160, 224, 6, 1, 3), (224, 384, 6, 2, 3),
                  (384, 640, 6, 1, 4), (640, 960, 6, 2, 1)]


def make_params(seed=0, num_classes=3):
    # Invariant: all padding (weights, BN scale/bias, biases) is ZERO, so
    # padded activation channels are exactly zero throughout the network.
    base = jax.random.PRNGKey(seed)
    ctr = iter(range(100000))

    def nk():
        return jax.random.fold_in(base, next(ctr))

    def dense(cin, cout):
        w = jax.random.normal(nk(), (cin, cout), jnp.float32) / math.sqrt(cin)
        return _pad_axis(_pad_axis(w, 0, _cp(cin)), 1, _cp(cout)).astype(jnp.bfloat16)

    def bn_fold(c, eps=1e-5):
        gamma = 1.0 + 0.1 * jax.random.normal(nk(), (c,), jnp.float32)
        beta = 0.1 * jax.random.normal(nk(), (c,), jnp.float32)
        running_mean = 0.1 * jax.random.normal(nk(), (c,), jnp.float32)
        running_var = jnp.ones((c,), jnp.float32)
        scale = gamma / jnp.sqrt(running_var + eps)
        bias = beta - running_mean * scale
        return _pad_axis(scale, 0, _cp(c)), _pad_axis(bias, 0, _cp(c))

    params = {}
    # stem: 3x3 stride-2 conv, 3->64, as an im2col matmul (K = 27, lane-padded)
    wstem = jax.random.normal(nk(), (27, 64), jnp.float32) / math.sqrt(27.0)
    params["stem_w"] = _pad_axis(_pad_axis(wstem, 0, _cp(27)), 1, _cp(64)).astype(jnp.bfloat16)
    params["stem_bn"] = bn_fold(64)

    blocks = []
    for in_c, out_c, exp, stride, reps in BLOCK_SETTINGS:
        cfgs = [(in_c, out_c, exp, stride)] + [(out_c, out_c, exp, 1)] * (reps - 1)
        for ci, co, e, s in cfgs:
            hidden = ci * e
            sq = int(hidden * 0.25)        # SqueezeExcite(hidden_dim, 0.25)
            bp = {}
            if e != 1:
                bp["expand"] = (dense(ci, hidden),) + bn_fold(hidden)
            else:
                bp["expand"] = None
            wd = jax.random.normal(nk(), (3, 3, hidden), jnp.float32) / 3.0
            bp["dw"] = (_pad_axis(wd, 2, _cp(hidden)),) + bn_fold(hidden)
            b1 = 0.01 * jax.random.normal(nk(), (1, sq), jnp.float32)
            b2 = 0.01 * jax.random.normal(nk(), (1, hidden), jnp.float32)
            bp["se"] = (dense(hidden, sq), _pad_axis(b1, 1, _cp(sq)),
                        dense(sq, hidden), _pad_axis(b2, 1, _cp(hidden)))
            bp["proj"] = (dense(hidden, co),) + bn_fold(co)
            bp["stride"] = s
            bp["residual"] = (s == 1 and ci == co)
            blocks.append(bp)
    params["blocks"] = blocks

    params["head_w"] = dense(960, 1280)
    params["head_bn"] = bn_fold(1280)
    params["fc_w"] = dense(1280, num_classes)
    params["fc_b"] = _pad_axis(
        0.01 * jax.random.normal(nk(), (num_classes,), jnp.float32), 0, _cp(num_classes))
    params["num_classes"] = num_classes
    return params


# ------------------------------- forward pass -------------------------------

def _im2col_3x3_stride2(x):
    """im2col for the stem 3x3 / stride-2 / pad-1 conv (tiny 3-channel input;
    XLA glue)."""
    n, h, w, c = x.shape
    xp = jnp.pad(x, ((0, 0), (1, 1), (1, 1), (0, 0)))
    ho = (h - 1) // 2 + 1
    wo = (w - 1) // 2 + 1
    cols = []
    for ky in range(3):
        for kx in range(3):
            cols.append(lax.slice(
                xp, (0, ky, kx, 0),
                (n, ky + 2 * (ho - 1) + 1, kx + 2 * (wo - 1) + 1, c),
                (1, 2, 2, 1)))
    patches = jnp.concatenate(cols, axis=-1)              # (N, Ho, Wo, 27)
    return patches.reshape(n * ho * wo, 9 * c), (n, ho, wo)


def mbconv_forward(x, bp):
    n, h, w, cin_p = x.shape
    out = x
    if bp["expand"] is not None:
        we, sc, bi = bp["expand"]
        out = matmul_bn_act(out.reshape(n * h * w, cin_p), we, sc, bi, act="silu")
        out = out.reshape(n, h, w, we.shape[1])
    wd, scd, bid = bp["dw"]
    out, pooled = depthwise3x3_bn_silu_pool(out, wd, scd, bid, stride=bp["stride"])
    w1, b1, w2, b2 = bp["se"]
    gate = se_gate(pooled, w1, b1, w2, b2)                 # (N, hidden_p) fp32
    wp, scp, bip = bp["proj"]
    nn_, ho, wo, hid_p = out.shape
    res = x.reshape(n, h * w, cin_p) if bp["residual"] else None
    out = proj_matmul_gated(out.reshape(nn_, ho * wo, hid_p), wp, scp, bip,
                            gate, res)
    return out.reshape(nn_, ho, wo, wp.shape[1])


def efficientnet_b7_forward(x_nchw, params):
    x = jnp.transpose(x_nchw, (0, 2, 3, 1)).astype(jnp.bfloat16)   # NCHW -> NHWC
    cols, (n, ho, wo) = _im2col_3x3_stride2(x)
    sc, bi = params["stem_bn"]
    h = matmul_bn_act(cols, params["stem_w"], sc, bi, act="silu")
    h = h.reshape(n, ho, wo, params["stem_w"].shape[1])
    for bp in params["blocks"]:
        h = mbconv_forward(h, bp)
    nn_, hh, ww, cc = h.shape
    sc, bi = params["head_bn"]
    h = matmul_bn_act(h.reshape(nn_ * hh * ww, cc), params["head_w"], sc, bi,
                      act="silu")
    h = h.reshape(nn_, hh, ww, params["head_w"].shape[1])
    pooled = global_avg_pool(h)                                     # (N, 1280p) fp32
    # TODO(synk): Dropout(0.5) is identity in eval mode; BatchNorm uses folded
    # running stats (inference).
    ncls = params["num_classes"]
    nclsp = params["fc_w"].shape[1]
    logits = matmul_bn_act(pooled.astype(jnp.bfloat16), params["fc_w"],
                           jnp.ones((nclsp,), jnp.float32), params["fc_b"],
                           act="none", out_dtype=jnp.float32)
    return logits[:, :ncls]


if __name__ == "__main__":
    key = jax.random.PRNGKey(0)
    x = jax.random.normal(key, (2, 3, 16, 16), jnp.float32)   # NCHW like PyTorch
    params = make_params(seed=0, num_classes=3)
    out = efficientnet_b7_forward(x, params)
    out = jax.block_until_ready(out)
    assert out.shape == (2, 3), out.shape
    assert bool(jnp.all(jnp.isfinite(out)))
    print("KERNEL_OK")
</pallas_src>

<mosaic_0001>
module attributes {stable_mosaic.version = 11 : i64} {
  func.func @_mm2d_kernel(%arg0: i32, %arg1: i32, %arg2: i32, %arg3: memref<128x128xbf16, #tpu.memory_space<vmem>>, %arg4: memref<128x128xbf16, #tpu.memory_space<vmem>>, %arg5: memref<1x128xf32, #tpu.memory_space<vmem>>, %arg6: memref<1x128xf32, #tpu.memory_space<vmem>>, %arg7: memref<128x128xbf16, #tpu.memory_space<vmem>>, %arg8: memref<128x128xf32, #tpu.memory_space<vmem>>) attributes {dimension_semantics = [#tpu.dimension_semantics<parallel>, #tpu.dimension_semantics<parallel>, #tpu.dimension_semantics<arbitrary>], iteration_bounds = array<i64: 1, 1, 1>, scalar_prefetch = 0 : i64, scratch_operands = 1 : i64, tpu.core_type = #tpu.core_type<tc>, window_params = [{transform_indices = @transform_0, window_bounds = array<i64: 128, 128>}, {transform_indices = @transform_1, window_bounds = array<i64: 128, 128>}, {transform_indices = @transform_2, window_bounds = array<i64: 1, 128>}, {transform_indices = @transform_3, window_bounds = array<i64: 1, 128>}, {transform_indices = @transform_4, window_bounds = array<i64: 128, 128>}]} {
    %c0_i32 = arith.constant 0 : i32
    %0 = arith.cmpi eq, %arg2, %c0_i32 : i32
    %1 = arith.extui %0 : i1 to i32
    %c0_i32_0 = arith.constant 0 : i32
    %2 = arith.cmpi ne, %1, %c0_i32_0 : i32
    scf.if %2 {
      %cst_10 = arith.constant 0.000000e+00 : f32
      %12 = vector.broadcast %cst_10 : f32 to vector<128x128xf32>
      %c0_11 = arith.constant 0 : index
      %c0_12 = arith.constant 0 : index
      %13 = vector.load %arg8[%c0_11, %c0_12] : memref<128x128xf32, #tpu.memory_space<vmem>>, vector<128x128xf32>
      tpu.vector_store %arg8[%c0_11, %c0_12], %12 {strides = array<i32>} : memref<128x128xf32, #tpu.memory_space<vmem>>, vector<128x128xf32>,
    } else {
    }
    %c0 = arith.constant 0 : index
    %c0_1 = arith.constant 0 : index
    %3 = vector.load %arg8[%c0, %c0_1] : memref<128x128xf32, #tpu.memory_space<vmem>>, vector<128x128xf32>
    %c0_2 = arith.constant 0 : index
    %c0_3 = arith.constant 0 : index
    %4 = vector.load %arg3[%c0_2, %c0_3] : memref<128x128xbf16, #tpu.memory_space<vmem>>, vector<128x128xbf16>
    %c0_4 = arith.constant 0 : index
    %c0_5 = arith.constant 0 : index
    %5 = vector.load %arg4[%c0_4, %c0_5] : memref<128x128xbf16, #tpu.memory_space<vmem>>, vector<128x128xbf16>
    %cst = arith.constant dense<0.000000e+00> : vector<128x128xf32>
    %6 = tpu.matmul %4, %5, %cst {dimension_numbers = #tpu.dot_dimension_numbers<[1], [0], [0], [1], [0, 0, 1, 1], [], []>} : vector<128x128xbf16>, vector<128x128xbf16>, vector<128x128xf32> -> vector<128x128xf32>
    %7 = arith.addf %3, %6 : vector<128x128xf32>
    %c0_6 = arith.constant 0 : index
    %c0_7 = arith.constant 0 : index
    %8 = vector.load %arg8[%c0_6, %c0_7] : memref<128x128xf32, #tpu.memory_space<vmem>>, vector<128x128xf32>
    tpu.vector_store %arg8[%c0_6, %c0_7], %7 {strides = array<i32>} : memref<128x128xf32, #tpu.memory_space<vmem>>, vector<128x128xf32>,
    %c0_i32_8 = arith.constant 0 : i32
    %9 = arith.cmpi eq, %arg2, %c0_i32_8 : i32
    %10 = arith.extui %9 : i1 to i32
    %c0_i32_9 = arith.constant 0 : i32
    %11 = arith.cmpi ne, %10, %c0_i32_9 : i32
    scf.if %11 {
      %c0_10 = arith.constant 0 : index
      %c0_11 = arith.constant 0 : index
      %12 = vector.load %arg8[%c0_10, %c0_11] : memref<128x128xf32, #tpu.memory_space<vmem>>, vector<128x128xf32>
      %c0_12 = arith.constant 0 : index
      %c0_13 = arith.constant 0 : index
      %13 = vector.load %arg5[%c0_12, %c0_13] : memref<1x128xf32, #tpu.memory_space<vmem>>, vector<1x128xf32>
      %14 = vector.broadcast %13 : vector<1x128xf32> to vector<128x128xf32>
      %15 = arith.mulf %12, %14 : vector<128x128xf32>
      %c0_14 = arith.constant 0 : index
      %c0_15 = arith.constant 0 : index
      %16 = vector.load %arg6[%c0_14, %c0_15] : memref<1x128xf32, #tpu.memory_space<vmem>>, vector<1x128xf32>
      %17 = vector.broadcast %16 : vector<1x128xf32> to vector<128x128xf32>
      %18 = arith.addf %15, %17 : vector<128x128xf32>
      %19 = arith.negf %18 : vector<128x128xf32>
      %20 = math.exp %19 : vector<128x128xf32>
      %cst_16 = arith.constant 1.000000e+00 : f32
      %21 = vector.broadcast %cst_16 : f32 to vector<128x128xf32>
      %22 = arith.addf %21, %20 : vector<128x128xf32>
      %23 = arith.divf %21, %22 : vector<128x128xf32>
      %24 = arith.mulf %18, %23 : vector<128x128xf32>
      %25 = arith.truncf %24 : vector<128x128xf32> to vector<128x128xbf16>
      %c0_17 = arith.constant 0 : index
      %c0_18 = arith.constant 0 : index
      %26 = vector.load %arg7[%c0_17, %c0_18] : memref<128x128xbf16, #tpu.memory_space<vmem>>, vector<128x128xbf16>
      tpu.vector_store %arg7[%c0_17, %c0_18], %25 {strides = array<i32>} : memref<128x128xbf16, #tpu.memory_space<vmem>>, vector<128x128xbf16>,
    } else {
    }
    return
  }
  func.func @transform_0(%arg0: i32, %arg1: i32, %arg2: i32) -> (i32, i32) {
    %c0_i32 = arith.constant 0 : i32
    return %arg0, %arg2 : i32, i32
  }
  func.func @transform_1(%arg0: i32, %arg1: i32, %arg2: i32) -> (i32, i32) {
    %c0_i32 = arith.constant 0 : i32
    return %arg2, %arg1 : i32, i32
  }
  func.func @transform_2(%arg0: i32, %arg1: i32, %arg2: i32) -> (i32, i32) {
    %c0_i32 = arith.constant 0 : i32
    %c0_i32_0 = arith.constant 0 : i32
    return %c0_i32, %arg1 : i32, i32
  }
  func.func @transform_3(%arg0: i32, %arg1: i32, %arg2: i32) -> (i32, i32) {
    %c0_i32 = arith.constant 0 : i32
    %c0_i32_0 = arith.constant 0 : i32
    return %c0_i32, %arg1 : i32, i32
  }
  func.func @transform_4(%arg0: i32, %arg1: i32, %arg2: i32) -> (i32, i32) {
    %c0_i32 = arith.constant 0 : i32
    return %arg0, %arg1 : i32, i32
  }
}

</mosaic_0001>

<bundles_post_ra>
// kernel: matmul_bn_act.1
= control target key start
LH: loop header
LB: loop body
LE: loop exit
PB: predicated region body
PF: predicated region fallthrough
CT: control target
= control target key end

     0   :  { %s1052_s0 = inlined_call_operand.vmem [shape: bf16[128,128], index: 0, kind: input, shape index: {}]   ;;  %s1053_s1 = inlined_call_operand.vmem [shape: bf16[128,128], index: 1, kind: input, shape index: {}]   ;;  %s1054_s2 = inlined_call_operand.vmem [shape: f32[1,128], index: 2, kind: input, shape index: {}]   ;;  %s1055_s3 = inlined_call_operand.vmem [shape: f32[1,128], index: 3, kind: input, shape index: {}]   ;;  %s1056_s4 = inlined_call_operand.hbm [shape: bf16[128,128], index: 4, kind: output, shape index: {}]  }
   0x1   :  { %v765_v0 = vld [vmem:[%s1053_s1 + $0x38] sm:$0xff]   ;;  %v766_v1 = vld [vmem:[%s1053_s1 + $0x30] sm:$0xff]   ;;  %v767_v2 = vld [vmem:[%s1053_s1 + $0x28] sm:$0xff]  }
   0x2   :  { %714 = vmatprep.subr.bf16.mxu0 %v765_v0  ;;  %746 = vmatprep.subr.bf16.mxu1 %v765_v0  ;;  %v768_v3 = vld [vmem:[%s1053_s1 + $0x20] sm:$0xff]   ;;  %v769_v6 = vld [vmem:[%s1053_s1 + $0x18] sm:$0xff]   ;;  %v770_v7 = vld [vmem:[%s1053_s1 + $0x10] sm:$0xff]  }
   0x3   :  { %715 = vmatpush3.bf16.msra.mxu0 %v765_v0  ;;  %754 = vmatpush3.bf16.msra.mxu1 %v765_v0  ;;  %v773_v4 = vld [vmem:[%s1052_s0] sm:$0xff]  }
   0x4   :  { %716 = vmatprep.subr.bf16.mxu0 %v766_v1  ;;  %747 = vmatprep.subr.bf16.mxu1 %v766_v1  ;;  %v774_v5 = vld [vmem:[%s1052_s0 + $0x20] sm:$0xff]  }
   0x5   :  { %730 = vmatprep.mubr.bf16.mxu0 %v773_v4  ;;  %738 = vmatprep.mubr.bf16.mxu1 %v774_v5 }
   0x7   :  { %717 = vmatpush3.bf16.msra.mxu0 %v766_v1  ;;  %755 = vmatpush3.bf16.msra.mxu1 %v766_v1 }
   0x8   :  { %718 = vmatprep.subr.bf16.mxu0 %v767_v2  ;;  %748 = vmatprep.subr.bf16.mxu1 %v767_v2 }
   0xb   :  { %719 = vmatpush3.bf16.msra.mxu0 %v767_v2  ;;  %756 = vmatpush3.bf16.msra.mxu1 %v767_v2 }
   0xc   :  { %720 = vmatprep.subr.bf16.mxu0 %v768_v3  ;;  %749 = vmatprep.subr.bf16.mxu1 %v768_v3 }
   0xf   :  { %721 = vmatpush3.bf16.msra.mxu0 %v768_v3  ;;  %757 = vmatpush3.bf16.msra.mxu1 %v768_v3 }
  0x10   :  { %722 = vmatprep.subr.bf16.mxu0 %v769_v6  ;;  %750 = vmatprep.subr.bf16.mxu1 %v769_v6 }
  0x11   :  { %9 = vsyncpa [#allocation4], 0  ;;  %v771_v8 = vld [vmem:[%s1053_s1 + $0x8] sm:$0xff]   ;;  %v772_v9 = vld [vmem:[%s1053_s1] sm:$0xff]  }
  0x12   :  { %v775_v10 = vld [vmem:[%s1052_s0 + $0x8] sm:$0xff]   ;;  %v777_v12 = vld [vmem:[%s1052_s0 + $0x10] sm:$0xff]   ;;  %v779_v14 = vld [vmem:[%s1052_s0 + $0x18] sm:$0xff]  }
  0x13   :  { %723 = vmatpush3.bf16.msra.mxu0 %v769_v6  ;;  %758 = vmatpush3.bf16.msra.mxu1 %v769_v6  ;;  %v776_v11 = vld [vmem:[%s1052_s0 + $0x28] sm:$0xff]   ;;  %v778_v13 = vld [vmem:[%s1052_s0 + $0x30] sm:$0xff]   ;;  %v780_v15 = vld [vmem:[%s1052_s0 + $0x38] sm:$0xff]   ;;  %s867_s0 = smov [#allocation3]  }
  0x14   :  { %724 = vmatprep.subr.bf16.mxu0 %v770_v7  ;;  %751 = vmatprep.subr.bf16.mxu1 %v770_v7  ;;  %v946_v16 = vld [vmem:[%s1054_s2] ss:$0 sm:$0xff]  ;;  %s574_s2 = sshll.u32 %s867_s0, 4  ;;  %s575_s2 = int_to_ptr.vmem [resolvable:$true] %s574_s2 }
  0x15   :  { %v951_v18 = vld [vmem:[%s1055_s3] ss:$0 sm:$0xff]  ;;  %s845_s3 = scalar_lea.vmem %s575_s2, 1024  ;;  %p850_p1 = scmp.lt.s32.totalorder %s575_s2, %s575_s2 }
  0x16   :  { %p846_p0 = scmp.ne.s32.totalorder %s575_s2, %s845_s3  ;;  %p851_p2 = scmp.lt.s32.totalorder %s845_s3, %s845_s3 }
  0x17   :  { %725 = vmatpush3.bf16.msra.mxu0 %v770_v7  ;;  %759 = vmatpush3.bf16.msra.mxu1 %v770_v7 }
  0x18   :  { %726 = vmatprep.subr.bf16.mxu0 %v771_v8  ;;  %752 = vmatprep.subr.bf16.mxu1 %v771_v8  ;;  %p852_p3 = por %p851_p2, %p850_p1 }
  0x1a   :  { %p853_p4 = pnand %p852_p3, %p846_p0 }
  0x1b   :  { %727 = vmatpush3.bf16.msra.mxu0 %v771_v8  ;;  %760 = vmatpush3.bf16.msra.mxu1 %v771_v8 }
  0x1c   :  { %728 = vmatprep.subr.bf16.mxu0 %v772_v9  ;;  %753 = vmatprep.subr.bf16.mxu1 %v772_v9 }
  0x1f   :  { %729 = vmatpush3.bf16.msra.mxu0 %v772_v9  ;;  %761 = vmatpush3.bf16.msra.mxu1 %v772_v9 }
  0x22   :  { %731 = vmatmul.mubr.bf16.vlgmr.msra.gmra.mxu0 %v775_v10  ;;  %739 = vmatmul.mubr.bf16.vlgmr.msra.gmra.mxu1 %v776_v11 }
  0x23   :  { %734 = vmatprep.mubr.bf16.mxu0 %v777_v12  ;;  %742 = vmatprep.mubr.bf16.mxu1 %v778_v13 }
  0x2a   :  { %735 = vmatmul.mubr.bf16.gmra.mxu0 %v779_v14  ;;  %743 = vmatmul.mubr.bf16.gmra.mxu1 %v780_v15 }
  0xe2   :  { %v732_v17 = vpop.f32.mrf.mxu0  ;;  %v740_v19 = vpop.f32.mrf.mxu1 }
  0xe3   :  { %v340_v20 = vmul.f32 %v732_v17, %v946_v16  ;;  %v348_v21 = vmul.f32 %v740_v19, %v946_v16 }
  0xe4   :  { %v217_v22 = vpop.f32.mrf.mxu0  ;;  %v249_v23 = vpop.f32.mrf.mxu1 }
  0xe5   :  { %v956_v24 = vadd.f32 %v951_v18, %v340_v20  ;;  %v959_v25 = vadd.f32 %v951_v18, %v348_v21  ;;  %v338_v26 = vmul.f32 %v946_v16, %v217_v22  ;;  %v346_v27 = vmul.f32 %v946_v16, %v249_v23 }
  0xe6   :  { %v733_v28 = vpop.f32.mrf.mxu0  ;;  %v741_v29 = vpop.f32.mrf.mxu1 }
  0xe7   :  { %v605_v30 = vmul.f32 -1.442695, %v956_v24  ;;  %v613_v31 = vmul.f32 -1.442695, %v959_v25  ;;  %v966_v32 = vadd.f32 %v951_v18, %v338_v26  ;;  %v969_v33 = vadd.f32 %v951_v18, %v346_v27 }
  0xe8   :  { %v341_v34 = vmul.f32 %v733_v28, %v946_v16  ;;  %v349_v35 = vmul.f32 %v741_v29, %v946_v16  ;;  %v220_v36 = vpop.f32.mrf.mxu0  ;;  %v252_v37 = vpop.f32.mrf.mxu1 }
  0xe9   :  { %781 = vpow2.f32 %v605_v30  ;;  %v603_v38 = vmul.f32 -1.442695, %v966_v32  ;;  %v611_v39 = vmul.f32 -1.442695, %v969_v33  ;;  %v339_v40 = vmul.f32 %v946_v16, %v220_v36 }
  0xea   :  { %783 = vpow2.f32 %v613_v31  ;;  %v977_v41 = vadd.f32 %v951_v18, %v341_v34  ;;  %v980_v42 = vadd.f32 %v951_v18, %v349_v35  ;;  %v347_v43 = vmul.f32 %v946_v16, %v252_v37  ;;  %v736_v44 = vpop.f32.mrf.mxu0  ;;  %v744_v45 = vpop.f32.mrf.mxu1 }
  0xeb   :  { %785 = vpow2.f32 %v603_v38  ;;  %v984_v46 = vadd.f32 %v951_v18, %v339_v40  ;;  %v344_v47 = vmul.f32 %v736_v44, %v946_v16  ;;  %v352_v48 = vmul.f32 %v744_v45, %v946_v16 }
  0xec   :  { %787 = vpow2.f32 %v611_v39  ;;  %v606_v49 = vmul.f32 -1.442695, %v977_v41  ;;  %v614_v50 = vmul.f32 -1.442695, %v980_v42  ;;  %v991_v51 = vadd.f32 %v951_v18, %v347_v43  ;;  %v233_v52 = vpop.f32.mrf.mxu0  ;;  %v265_v53 = vpop.f32.mrf.mxu1 }
  0xed   :  { %v604_v54 = vmul.f32 -1.442695, %v984_v46  ;;  %v995_v55 = vadd.f32 %v951_v18, %v344_v47  ;;  %v998_v56 = vadd.f32 %v951_v18, %v352_v48  ;;  %v342_v57 = vmul.f32 %v946_v16, %v233_v52 }
  0xee   :  { %789 = vpow2.f32 %v606_v49  ;;  %v612_v58 = vmul.f32 -1.442695, %v991_v51  ;;  %v350_v59 = vmul.f32 %v946_v16, %v265_v53  ;;  %v737_v60 = vpop.f32.mrf.mxu0  ;;  %v745_v61 = vpop.f32.mrf.mxu1 }
  0xef   :  { %791 = vpow2.f32 %v614_v50  ;;  %v609_v62 = vmul.f32 -1.442695, %v995_v55  ;;  %v617_v63 = vmul.f32 -1.442695, %v998_v56  ;;  %v1006_v0 = vadd.f32 %v951_v18, %v342_v57 }
  0xf0   :  { %793 = vpow2.f32 %v604_v54  ;;  %v1009_v1 = vadd.f32 %v951_v18, %v350_v59  ;;  %v345_v2 = vmul.f32 %v737_v60, %v946_v16  ;;  %v353_v3 = vmul.f32 %v745_v61, %v946_v16  ;;  %v236_v4 = vpop.f32.mrf.mxu0  ;;  %v268_v5 = vpop.f32.mrf.mxu1 }
  0xf1   :  { %795 = vpow2.f32 %v612_v58  ;;  %v607_v6 = vmul.f32 -1.442695, %v1006_v0  ;;  %v343_v7 = vmul.f32 %v946_v16, %v236_v4  ;;  %v351_v8 = vmul.f32 %v946_v16, %v268_v5 }
  0xf2   :  { %797 = vpow2.f32 %v609_v62  ;;  %v615_v9 = vmul.f32 -1.442695, %v1009_v1  ;;  %v1018_v10 = vadd.f32 %v951_v18, %v345_v2  ;;  %v1021_v11 = vadd.f32 %v951_v18, %v353_v3 }
  0xf3   :  { %799 = vpow2.f32 %v617_v63  ;;  %v1024_v12 = vadd.f32 %v951_v18, %v343_v7  ;;  %v1030_v16 = vadd.f32 %v951_v18, %v351_v8 }
  0xf4   :  { %801 = vpow2.f32 %v607_v6  ;;  %v610_v13 = vmul.f32 -1.442695, %v1018_v10  ;;  %v618_v14 = vmul.f32 -1.442695, %v1021_v11 }
  0xf5   :  { %803 = vpow2.f32 %v615_v9  ;;  %v608_v15 = vmul.f32 -1.442695, %v1024_v12  ;;  %v616_v27 = vmul.f32 -1.442695, %v1030_v16 }
  0xf6   :  { %v782_v17 = vpop.eup %781  ;;  %805 = vpow2.f32 %v610_v13 }
  0xf7   :  { %v784_v19 = vpop.eup %783  ;;  %v427_v20 = vadd.f32 1.0, %v782_v17  ;;  %807 = vpow2.f32 %v618_v14 }
  0xf8   :  { %v786_v21 = vpop.eup %785  ;;  %v435_v22 = vadd.f32 1.0, %v784_v19  ;;  %809 = vpow2.f32 %v608_v15 }
  0xf9   :  { %v788_v23 = vpop.eup %787  ;;  %811 = vrcp.f32 %v427_v20  ;;  %v425_v26 = vadd.f32 1.0, %v786_v21 }
  0xfa   :  { %813 = vrcp.f32 %v435_v22  ;;  %v433_v28 = vadd.f32 1.0, %v788_v23 }
  0xfb   :  { %v790_v29 = vpop.eup %789  ;;  %815 = vrcp.f32 %v425_v26 }
  0xfc   :  { %v792_v30 = vpop.eup %791  ;;  %817 = vrcp.f32 %v433_v28  ;;  %v428_v18 = vadd.f32 1.0, %v790_v29 }
  0xfd   :  { %v794_v31 = vpop.eup %793  ;;  %v436_v34 = vadd.f32 1.0, %v792_v30  ;;  %819 = vpow2.f32 %v616_v27 }
  0xfe   :  { %v796_v35 = vpop.eup %795  ;;  %821 = vrcp.f32 %v428_v18  ;;  %v426_v36 = vadd.f32 1.0, %v794_v31 }
  0xff   :  { %v798_v37 = vpop.eup %797  ;;  %823 = vrcp.f32 %v436_v34  ;;  %v434_v38 = vadd.f32 1.0, %v796_v35 }
 0x100   :  { %v800_v39 = vpop.eup %799  ;;  %825 = vrcp.f32 %v426_v36  ;;  %v431_v40 = vadd.f32 1.0, %v798_v37 }
 0x101   :  { %v802_v43 = vpop.eup %801  ;;  %827 = vrcp.f32 %v434_v38  ;;  %v439_v44 = vadd.f32 1.0, %v800_v39 }
 0x102   :  { %v804_v45 = vpop.eup %803  ;;  %v429_v47 = vadd.f32 1.0, %v802_v43  ;;  %829 = vrcp.f32 %v431_v40 }
 0x103   :  { %v806_v48 = vpop.eup %805  ;;  %831 = vrcp.f32 %v439_v44  ;;  %v437_v59 = vadd.f32 1.0, %v804_v45 }
 0x104   :  { %v808_v49 = vpop.eup %807  ;;  %v432_v50 = vadd.f32 1.0, %v806_v48  ;;  %833 = vrcp.f32 %v429_v47 }
 0x105   :  { %v810_v52 = vpop.eup %809  ;;  %v440_v53 = vadd.f32 1.0, %v808_v49 }
 0x106   :  { %v812_v54 = vpop.eup %811  ;;  %835 = vrcp.f32 %v432_v50  ;;  %v430_v57 = vadd.f32 1.0, %v810_v52 }
 0x107   :  { %v814_v58 = vpop.eup %813  ;;  %837 = vrcp.f32 %v440_v53  ;;  %v475_v4 = vmul.f32 %v812_v54, %v956_v24 }
 0x108   :  { %v816_v60 = vpop.eup %815  ;;  %839 = vrcp.f32 %v430_v57  ;;  %v483_v7 = vmul.f32 %v814_v58, %v959_v25 }
 0x109   :  { %v818_v61 = vpop.eup %817  ;;  %841 = vrcp.f32 %v437_v59  ;;  %v473_v13 = vmul.f32 %v816_v60, %v966_v32 }
 0x10a   :  { %v820_v62 = vpop.eup %819  ;;  %v481_v17 = vmul.f32 %v818_v61, %v969_v33 }
 0x10b   :  { %v822_v63 = vpop.eup %821  ;;  %v438_v2 = vadd.f32 1.0, %v820_v62 }
 0x10c   :  { %v824_v3 = vpop.eup %823  ;;  %v476_v5 = vmul.f32 %v822_v63, %v977_v41 }
 0x10d   :  { %v826_v6 = vpop.eup %825  ;;  %v484_v8 = vmul.f32 %v824_v3, %v980_v42  ;;  %843 = vrcp.f32 %v438_v2 }
 0x10e   :  { %v828_v9 = vpop.eup %827  ;;  %v659_v14 = vpack.c.bf16 %v476_v5, %v475_v4  ;;  %v474_v15 = vmul.f32 %v826_v6, %v984_v46 }
 0x10f   :  { %v679_v19 = vpack.c.bf16 %v484_v8, %v483_v7  ;;  %v482_v20 = vmul.f32 %v828_v9, %v991_v51  ;;  %v830_v24 = vpop.eup %829 }
 0x110   :  { %691 = vst [vmem:[#allocation3 + $0x8] sm:$0xff] %v659_v14   ;;  %v654_v41 = vpack.c.bf16 %v474_v15, %v473_v13  ;;  %v832_v21 = vpop.eup %831  ;;  %v479_v32 = vmul.f32 %v830_v24, %v995_v55 }
 0x111   :  { %695 = vst [vmem:[#allocation3 + $0x28] sm:$0xff] %v679_v19   ;;  %v674_v25 = vpack.c.bf16 %v482_v20, %v481_v17  ;;  %v834_v22 = vpop.eup %833  ;;  %v487_v33 = vmul.f32 %v832_v21, %v998_v56 }
 0x112   :  { %655 = vst [vmem:[#allocation3] sm:$0xff] %v654_v41   ;;  %v477_v27 = vmul.f32 %v834_v22, %v1006_v0 }
 0x113   :  { %v836_v42 = vpop.eup %835  ;;  %694 = vst [vmem:[#allocation3 + $0x20] sm:$0xff] %v674_v25  }
 0x114   :  { %v838_v23 = vpop.eup %837  ;;  %v480_v46 = vmul.f32 %v836_v42, %v1018_v10 }
 0x115   :  { %v840_v26 = vpop.eup %839  ;;  %v488_v51 = vmul.f32 %v838_v23, %v1021_v11 }
 0x116   :  { %v669_v28 = vpack.c.bf16 %v480_v46, %v479_v32  ;;  %v478_v29 = vmul.f32 %v840_v26, %v1024_v12  ;;  %v842_v18 = vpop.eup %841 }
 0x117   :  { %v689_v30 = vpack.c.bf16 %v488_v51, %v487_v33  ;;  %v485_v10 = vmul.f32 %v842_v18, %v1009_v1 }
 0x118   :  { %693 = vst [vmem:[#allocation3 + $0x18] sm:$0xff] %v669_v28   ;;  %v664_v31 = vpack.c.bf16 %v478_v29, %v477_v27 }
 0x119   :  { %697 = vst [vmem:[#allocation3 + $0x38] sm:$0xff] %v689_v30  }
 0x11a   :  { %v844_v55 = vpop.eup %843  ;;  %692 = vst [vmem:[#allocation3 + $0x10] sm:$0xff] %v664_v31  }
 0x11b   :  { %v486_v56 = vmul.f32 %v844_v55, %v1030_v16 }
 0x11d   :  { %v684_v11 = vpack.c.bf16 %v486_v56, %v485_v10 }
 0x11f   :  { %696 = vst [vmem:[#allocation3 + $0x30] sm:$0xff] %v684_v11  }
 0x120   :  { %856 = shalt.err (!%p853_p4)
}
 0x121   :  { %s868_s24 = smov 64   ;;  %s869_s25 = smov 4  }
 0x122   :  { %580 = dma.vmem_to_hbm [thread:$0]  %s575_s2, 1024, %s1056_s4, [#allocation4], %s868_s24, %s868_s24, %s869_s25  }
 0x123   :  { %865 = dma.done.wait [#allocation4], 1024  }
 0x124   :  { %866 = vsyncadd [#allocation4], 4294966272 }
 0x125   :  { %584 = vsyncpa [#allocation4], 1 }

</bundles_post_ra>
